<compile_context>
chip_gen: v7x
topology: tpu7x:2x2x1
jax: 0.10.0
libtpu: 0.0.40
codegen_flags: <defaults>
</compile_context>

<pallas_src>
import jax
import jax.numpy as jnp
from jax.experimental import pallas as pl
from jax.experimental.pallas import tpu as pltpu


def _rls_kernel(x_ref, p_ref, w_ref, e_ref, p_out_ref, w_out_ref):
    # Per grid step:
    #   x_ref : (1, N)      shared input row vector
    #   p_ref : (G, N, N)   G output units' P matrices
    #   w_ref : (G, 1, N)   G weight rows
    #   e_ref : (G, 1, 1)   G error scalars
    x = x_ref[...]                         # (1, N)
    P = p_ref[...]                         # (G, N, N)
    w = w_ref[...]                         # (G, 1, N)
    e = e_ref[...]                         # (G, 1, 1)

    xb = x[None, :, :]                     # (1, 1, N) — broadcasts over G and rows

    # Prs[g, j] = sum_k P[g, j, k] * x[k]
    # Exact f32 on the VPU (multiply) + lane reduce; P is read only once here.
    # TODO(synk): for very large in_num this matvec could be moved to the MXU as a
    # single (G*N, N) x (N, 1) matmul; the kernel is HBM-bound so it is not needed
    # at these sizes.
    prs_col = jnp.sum(P * xb, axis=2, keepdims=True)            # (G, N, 1)
    prs_row = jnp.swapaxes(prs_col, 1, 2)                       # (G, 1, N) tiny relayout

    # a[g] = 1 / (1 + sum_j x[j] * Prs[g, j])
    denom = 1.0 + jnp.sum(xb * prs_row, axis=2, keepdims=True)  # (G, 1, 1)
    a = 1.0 / denom                                             # exact f32 divide

    # P <- P - a * Prs Prs^T   (batched rank-1 update, pure VPU broadcasts)
    p_out_ref[...] = P - (a * prs_col) * prs_row                # (G, N, N)
    # w <- w - (a * error) * Prs
    w_out_ref[...] = w - (a * e) * prs_row                      # (G, 1, N)


def _choose_group_size(out_num, in_num, target_block_bytes):
    """Largest divisor of out_num whose (G, N, N) f32 P block fits the target."""
    per_unit = in_num * in_num * 4
    cap = max(1, target_block_bytes // per_unit)
    g = int(min(out_num, cap))
    while out_num % g:
        g -= 1
    return g


def rls_update(P, w, x, error, *, target_block_bytes=2 * 1024 * 1024):
    """Functional RLS step. Returns (P_new, w_new)."""
    O, N, _ = P.shape
    G = _choose_group_size(O, N, target_block_bytes)
    num_steps = O // G

    x2 = x.reshape(1, N).astype(jnp.float32)
    w3 = w.reshape(O, 1, N).astype(jnp.float32)
    e3 = error.reshape(O, 1, 1).astype(jnp.float32)
    P = P.astype(jnp.float32)

    p_new, w_new = pl.pallas_call(
        _rls_kernel,
        out_shape=(
            jax.ShapeDtypeStruct((O, N, N), jnp.float32),
            jax.ShapeDtypeStruct((O, 1, N), jnp.float32),
        ),
        grid_spec=pltpu.PrefetchScalarGridSpec(
            num_scalar_prefetch=0,
            grid=(num_steps,),
            in_specs=[
                pl.BlockSpec((1, N), lambda i: (0, 0)),          # input (shared)
                pl.BlockSpec((G, N, N), lambda i: (i, 0, 0)),    # P block
                pl.BlockSpec((G, 1, N), lambda i: (i, 0, 0)),    # w block
                pl.BlockSpec((G, 1, 1), lambda i: (i, 0, 0)),    # error block
            ],
            out_specs=[
                pl.BlockSpec((G, N, N), lambda i: (i, 0, 0)),    # P_new block
                pl.BlockSpec((G, 1, N), lambda i: (i, 0, 0)),    # w_new block
            ],
        ),
        compiler_params=pltpu.CompilerParams(
            dimension_semantics=("parallel",),
            # 2 MiB P blocks, double-buffered in + out (~8 MiB live) — explicit
            # limit keeps us safe on v7x's smaller (64 MiB physical) VMEM.
            vmem_limit_bytes=32 * 1024 * 1024,
        ),
    )(x2, P, w3, e3)

    return p_new, w_new.reshape(O, N)


def rls_reference(P, w, x, error):
    """Pure-JAX reference mirroring the PyTorch einsums exactly."""
    Prs = jnp.einsum('ijk,k->ij', P, x)
    a = 1.0 / (1.0 + jnp.einsum('j,ij->i', x, Prs))
    P_new = P - jnp.einsum('i,ij,ik->ijk', a, Prs, Prs)
    w_new = w - jnp.einsum('i,ij->ij', a * error, Prs)
    return P_new, w_new


if __name__ == "__main__":
    in_num = 32
    out_num = 8
    alpha = 1.0

    # Deterministic parameter / input construction (mirrors RLS.__init__).
    P0 = alpha * jnp.stack([jnp.eye(in_num, dtype=jnp.float32)] * out_num)

    key = jax.random.PRNGKey(0)
    kw, kx, ke = jax.random.split(key, 3)
    w0 = jax.random.normal(kw, (out_num, in_num), dtype=jnp.float32)
    x = jax.random.normal(kx, (in_num,), dtype=jnp.float32)
    err = jax.random.normal(ke, (out_num,), dtype=jnp.float32)

    P_ref, w_ref = rls_reference(P0, w0, x, err)

    # Case 1: default grouping — whole problem fits in a single grid step.
    P_new, w_new = rls_update(P0, w0, x, err)
    jax.block_until_ready((P_new, w_new))
    assert jnp.allclose(P_new, P_ref, atol=1e-5, rtol=1e-5), "P mismatch"
    assert jnp.allclose(w_new, w_ref, atol=1e-5, rtol=1e-5), "w mismatch"

    # Case 2: force a small group size to also exercise the multi-step grid path.
    P_new2, w_new2 = rls_update(
        P0, w0, x, err, target_block_bytes=2 * in_num * in_num * 4)
    jax.block_until_ready((P_new2, w_new2))
    assert jnp.allclose(P_new2, P_ref, atol=1e-5, rtol=1e-5), "P mismatch (tiled)"
    assert jnp.allclose(w_new2, w_ref, atol=1e-5, rtol=1e-5), "w mismatch (tiled)"

    print("KERNEL_OK")
</pallas_src>

<mosaic_0001>
module attributes {stable_mosaic.version = 11 : i64} {
  func.func @_rls_kernel(%arg0: i32, %arg1: memref<1x32xf32, #tpu.memory_space<vmem>>, %arg2: memref<8x32x32xf32, #tpu.memory_space<vmem>>, %arg3: memref<8x1x32xf32, #tpu.memory_space<vmem>>, %arg4: memref<8x1x1xf32, #tpu.memory_space<vmem>>, %arg5: memref<8x32x32xf32, #tpu.memory_space<vmem>>, %arg6: memref<8x1x32xf32, #tpu.memory_space<vmem>>) attributes {dimension_semantics = [#tpu.dimension_semantics<parallel>], iteration_bounds = array<i64: 1>, scalar_prefetch = 0 : i64, scratch_operands = 0 : i64, tpu.core_type = #tpu.core_type<tc>, window_params = [{pipeline_mode = #tpu.pipeline_mode<synchronous>, transform_indices = @transform_0, window_bounds = array<i64: 1, 32>}, {transform_indices = @transform_1, window_bounds = array<i64: 8, 32, 32>}, {transform_indices = @transform_2, window_bounds = array<i64: 8, 1, 32>}, {transform_indices = @transform_3, window_bounds = array<i64: 8, 1, 1>}, {transform_indices = @transform_4, window_bounds = array<i64: 8, 32, 32>}, {transform_indices = @transform_5, window_bounds = array<i64: 8, 1, 32>}]} {
    %c0 = arith.constant 0 : index
    %c0_0 = arith.constant 0 : index
    %0 = vector.load %arg1[%c0, %c0_0] : memref<1x32xf32, #tpu.memory_space<vmem>>, vector<1x32xf32>
    %c0_1 = arith.constant 0 : index
    %c0_2 = arith.constant 0 : index
    %c0_3 = arith.constant 0 : index
    %1 = vector.load %arg2[%c0_1, %c0_2, %c0_3] : memref<8x32x32xf32, #tpu.memory_space<vmem>>, vector<8x32x32xf32>
    %c0_4 = arith.constant 0 : index
    %c0_5 = arith.constant 0 : index
    %c0_6 = arith.constant 0 : index
    %2 = vector.load %arg3[%c0_4, %c0_5, %c0_6] : memref<8x1x32xf32, #tpu.memory_space<vmem>>, vector<8x1x32xf32>
    %c0_7 = arith.constant 0 : index
    %c0_8 = arith.constant 0 : index
    %c0_9 = arith.constant 0 : index
    %3 = vector.load %arg4[%c0_7, %c0_8, %c0_9] : memref<8x1x1xf32, #tpu.memory_space<vmem>>, vector<8x1x1xf32>
    %4 = vector.shape_cast %0 : vector<1x32xf32> to vector<1x1x32xf32>
    %5 = vector.broadcast %4 : vector<1x1x32xf32> to vector<8x32x32xf32>
    %6 = arith.mulf %1, %5 : vector<8x32x32xf32>
    %cst = arith.constant dense<0.000000e+00> : vector<8x32xf32>
    %7 = vector.multi_reduction <add>, %6, %cst [2] : vector<8x32x32xf32> to vector<8x32xf32>
    %8 = vector.shape_cast %7 : vector<8x32xf32> to vector<8x32x1xf32>
    %9 = tpu.transpose %8, [0, 2, 1] : vector<8x32x1xf32> -> vector<8x1x32xf32>
    %10 = vector.broadcast %4 : vector<1x1x32xf32> to vector<8x1x32xf32>
    %11 = arith.mulf %10, %9 : vector<8x1x32xf32>
    %cst_10 = arith.constant dense<0.000000e+00> : vector<8x1xf32>
    %12 = vector.multi_reduction <add>, %11, %cst_10 [2] : vector<8x1x32xf32> to vector<8x1xf32>
    %13 = vector.shape_cast %12 : vector<8x1xf32> to vector<8x1x1xf32>
    %cst_11 = arith.constant 1.000000e+00 : f32
    %14 = vector.broadcast %cst_11 : f32 to vector<8x1x1xf32>
    %15 = arith.addf %14, %13 : vector<8x1x1xf32>
    %cst_12 = arith.constant 1.000000e+00 : f32
    %16 = vector.broadcast %cst_12 : f32 to vector<8x1x1xf32>
    %17 = arith.divf %16, %15 : vector<8x1x1xf32>
    %18 = vector.broadcast %17 : vector<8x1x1xf32> to vector<8x32x1xf32>
    %19 = arith.mulf %18, %8 : vector<8x32x1xf32>
    %20 = vector.broadcast %19 : vector<8x32x1xf32> to vector<8x32x32xf32>
    %21 = vector.broadcast %9 : vector<8x1x32xf32> to vector<8x32x32xf32>
    %22 = arith.mulf %20, %21 : vector<8x32x32xf32>
    %23 = arith.subf %1, %22 : vector<8x32x32xf32>
    %c0_13 = arith.constant 0 : index
    %c0_14 = arith.constant 0 : index
    %c0_15 = arith.constant 0 : index
    %24 = vector.load %arg5[%c0_13, %c0_14, %c0_15] : memref<8x32x32xf32, #tpu.memory_space<vmem>>, vector<8x32x32xf32>
    tpu.vector_store %arg5[%c0_13, %c0_14, %c0_15], %23 {strides = array<i32>} : memref<8x32x32xf32, #tpu.memory_space<vmem>>, vector<8x32x32xf32>,
    %25 = arith.mulf %17, %3 : vector<8x1x1xf32>
    %26 = vector.broadcast %25 : vector<8x1x1xf32> to vector<8x1x32xf32>
    %27 = arith.mulf %26, %9 : vector<8x1x32xf32>
    %28 = arith.subf %2, %27 : vector<8x1x32xf32>
    %c0_16 = arith.constant 0 : index
    %c0_17 = arith.constant 0 : index
    %c0_18 = arith.constant 0 : index
    %29 = vector.load %arg6[%c0_16, %c0_17, %c0_18] : memref<8x1x32xf32, #tpu.memory_space<vmem>>, vector<8x1x32xf32>
    tpu.vector_store %arg6[%c0_16, %c0_17, %c0_18], %28 {strides = array<i32>} : memref<8x1x32xf32, #tpu.memory_space<vmem>>, vector<8x1x32xf32>,
    return
  }
  func.func @transform_0(%arg0: i32) -> (i32, i32) {
    %c0_i32 = arith.constant 0 : i32
    %c0_i32_0 = arith.constant 0 : i32
    %c0_i32_1 = arith.constant 0 : i32
    return %c0_i32, %c0_i32_0 : i32, i32
  }
  func.func @transform_1(%arg0: i32) -> (i32, i32, i32) {
    %c0_i32 = arith.constant 0 : i32
    %c0_i32_0 = arith.constant 0 : i32
    %c0_i32_1 = arith.constant 0 : i32
    return %arg0, %c0_i32, %c0_i32_0 : i32, i32, i32
  }
  func.func @transform_2(%arg0: i32) -> (i32, i32, i32) {
    %c0_i32 = arith.constant 0 : i32
    %c0_i32_0 = arith.constant 0 : i32
    %c0_i32_1 = arith.constant 0 : i32
    return %arg0, %c0_i32, %c0_i32_0 : i32, i32, i32
  }
  func.func @transform_3(%arg0: i32) -> (i32, i32, i32) {
    %c0_i32 = arith.constant 0 : i32
    %c0_i32_0 = arith.constant 0 : i32
    %c0_i32_1 = arith.constant 0 : i32
    return %arg0, %c0_i32, %c0_i32_0 : i32, i32, i32
  }
  func.func @transform_4(%arg0: i32) -> (i32, i32, i32) {
    %c0_i32 = arith.constant 0 : i32
    %c0_i32_0 = arith.constant 0 : i32
    %c0_i32_1 = arith.constant 0 : i32
    return %arg0, %c0_i32, %c0_i32_0 : i32, i32, i32
  }
  func.func @transform_5(%arg0: i32) -> (i32, i32, i32) {
    %c0_i32 = arith.constant 0 : i32
    %c0_i32_0 = arith.constant 0 : i32
    %c0_i32_1 = arith.constant 0 : i32
    return %arg0, %c0_i32, %c0_i32_0 : i32, i32, i32
  }
}

</mosaic_0001>

<bundles_post_ra>
// kernel: tpu_custom_call.1
= control target key start
LH: loop header
LB: loop body
LE: loop exit
PB: predicated region body
PF: predicated region fallthrough
CT: control target
= control target key end

     0   :  { %11 = vsyncpa [#allocation3], 0  ;;  %s1499_s0 = inlined_call_operand.vmem [shape: f32[1,32], index: 0, kind: input, shape index: {}]   ;;  %s1500_s1 = inlined_call_operand.hbm [shape: f32[8,32,32], index: 1, kind: input, shape index: {}]   ;;  %s1501_s2 = inlined_call_operand.vmem [shape: f32[8,1,32], index: 2, kind: input, shape index: {}]   ;;  %s1502_s3 = inlined_call_operand.vmem [shape: f32[8,1,1], index: 3, kind: input, shape index: {}]   ;;  %s1503_s4 = inlined_call_operand.hbm [shape: f32[8,32,32], index: 4, kind: output, shape index: {0}]   ;;  %s1504_s5 = inlined_call_operand.hbm [shape: f32[8,1,32], index: 5, kind: output, shape index: {1}]  }
   0x1   :  { %12 = vsyncpa [#allocation4], 0 }
   0x2   :  { %13 = vsyncpa [#allocation7], 0  ;;  %s928_s18 = smov [#allocation2]   ;;  %s856_s22 = scalar_lea.hbm %s1500_s1, 4096 }
   0x3   :  { %s21_s19 = sshll.u32 %s928_s18, 4  ;;  %p857_p0 = scmp.ne.s32.totalorder %s1500_s1, %s856_s22  ;;  %s22_s19 = int_to_ptr.vmem [resolvable:$true] %s21_s19 }
   0x4   :  { %p860_p1 = scmp.lt.u32.totalorder %s856_s22, %s1500_s1 }
   0x6   :  { %p862_p2 = pnand %p860_p1, %p857_p0 }
   0x8   :  { %865 = shalt.err (!%p862_p2)
}
   0x9   :  { %s866_s27 = scalar_lea.vmem %s22_s19, 4096  ;;  %p871_p4 = scmp.lt.s32.totalorder %s22_s19, %s22_s19 }
   0xa   :  { %p867_p3 = scmp.ne.s32.totalorder %s22_s19, %s866_s27  ;;  %p872_p5 = scmp.lt.s32.totalorder %s866_s27, %s866_s27 }
   0xc   :  { %p873_p6 = por %p872_p5, %p871_p4 }
   0xe   :  { %p874_p7 = pnand %p873_p6, %p867_p3 }
  0x10   :  { %877 = shalt.err (!%p874_p7)
}
  0x11   :  { %s929_s28 = smov 128   ;;  %s930_s29 = smov 8  }
  0x12   :  { %27 = dma.hbm_to_vmem [thread:$0]  %s1500_s1, 4096, %s22_s19, [#allocation3], %s929_s28, %s929_s28, %s930_s29  }
  0x13   :  { %922 = dma.done.wait [#allocation3], 4096  }
  0x14   :  { %923 = vsyncadd [#allocation3], 4294963200  ;;  %v85_v0 = vlaneseq  ;;  %v986_v3 = vld [vmem:[%s1499_s0] sm:$0x1]  ;;  %vm122_vm0 = vcmask 261120   ;;  %v1030_v27 = vld [vmem:[#allocation2 + $0x28] sm:$0xff] }
  0x15   :  { %v988_v4 = vld [vmem:[#allocation2 + $0x40] sm:$0xff]  ;;  %v1032_v28 = vld [vmem:[#allocation2 + $0x8] sm:$0xff]  ;;  %v1070_v51 = vld [vmem:[#allocation2 + $0x30] sm:$0xff]  ;;  %vm483_vm1 = vcmask 253952  }
  0x16   :  { %v86_v1 = vshrl.u32 %v85_v0, 7  ;;  %v990_v5 = vld [vmem:[#allocation2] sm:$0xff]  ;;  %v1040_v33 = vld [vmem:[#allocation2 + $0x68] sm:$0xff]  ;;  %v1072_v52 = vld [vmem:[#allocation2 + $0x10] sm:$0xff] }
  0x17   :  { %v996_v7 = vld [vmem:[#allocation2 + $0x60] sm:$0xff]  ;;  %v1042_v34 = vld [vmem:[#allocation2 + $0x48] sm:$0xff]  ;;  %v1080_v57 = vld [vmem:[#allocation2 + $0x70] sm:$0xff] }
  0x18   :  { %v981_v2 = vsub.s32 0, %v86_v1  ;;  %v998_v8 = vld [vmem:[#allocation2 + $0x20] sm:$0xff]  ;;  %v1050_v39 = vld [vmem:[#allocation2 + $0xa8] sm:$0xff]  ;;  %v1082_v58 = vld [vmem:[#allocation2 + $0x50] sm:$0xff] }
  0x19   :  { %v1008_v13 = vld [vmem:[#allocation2 + $0xa0] sm:$0xff]  ;;  %1540 = vst [vmem:[#allocation15_spill] sm:$0xff] %v1050_v39  ;;  %v1052_v40 = vld [vmem:[#allocation2 + $0x88] sm:$0xff]  ;;  %v1090_v63 = vld [vmem:[#allocation2 + $0xb0] sm:$0xff] }
  0x1a   :  { %v994_v6 = vrot.slane %v986_v3, %v981_v2  ;;  %1536 = vst [vmem:[#allocation11_spill] sm:$0xff] %v1008_v13  ;;  %v1010_v14 = vld [vmem:[#allocation2 + $0x80] sm:$0xff]  ;;  %1541 = vst [vmem:[#allocation16_spill] sm:$0xff] %v1052_v40  ;;  %v1060_v45 = vld [vmem:[#allocation2 + $0xe8] sm:$0xff] }
  0x1b   :  { %1537 = vst [vmem:[#allocation12_spill] sm:$0xff] %v1010_v14  ;;  %v1020_v21 = vld [vmem:[#allocation2 + $0xe0] sm:$0xff]  ;;  %1542 = vst [vmem:[#allocation17_spill] sm:$0xff] %v1060_v45  ;;  %v1062_v46 = vld [vmem:[#allocation2 + $0xc8] sm:$0xff] }
  0x1c   :  { %v98_v9 = vmul.f32 %v994_v6, %v988_v4  ;;  %v90_v10 = vmul.f32 %v994_v6, %v990_v5  ;;  %v102_v11 = vmul.f32 %v994_v6, %v996_v7  ;;  %v94_v12 = vmul.f32 %v994_v6, %v998_v8  ;;  %1538 = vst [vmem:[#allocation13_spill] sm:$0xff] %v1020_v21  ;;  %v1022_v22 = vld [vmem:[#allocation2 + $0xc0] sm:$0xff]  ;;  %v1092_v0 = vld [vmem:[#allocation2 + $0x90] sm:$0xff] }
  0x1d   :  { %v110_v19 = vmul.f32 %v994_v6, %v1008_v13  ;;  %v106_v20 = vmul.f32 %v994_v6, %v1010_v14  ;;  %1539 = vst [vmem:[#allocation14_spill] sm:$0xff] %v1022_v22  ;;  %v118_v25 = vmul.f32 %v994_v6, %v1020_v21  ;;  %v114_v26 = vmul.f32 %v994_v6, %v1022_v22 }
  0x1e   :  { %v147_v15 = vsel %vm122_vm0, %v98_v9, 0.0  ;;  %v123_v16 = vsel %vm122_vm0, %v90_v10, 0.0  ;;  %v159_v17 = vsel %vm122_vm0, %v102_v11, 0.0  ;;  %v135_v18 = vsel %vm122_vm0, %v94_v12, 0.0  ;;  %1543 = vst [vmem:[#allocation18_spill] sm:$0xff] %v1062_v46  ;;  %1544 = vst [vmem:[#allocation19_spill] sm:$0xff] %v1090_v63 }
  0x1f   :  { %148 = vadd.xlane.f32.xlu1 %v147_v15  ;;  %124 = vadd.xlane.f32.xlu0 %v123_v16  ;;  %v183_v23 = vsel %vm122_vm0, %v110_v19, 0.0  ;;  %v171_v24 = vsel %vm122_vm0, %v106_v20, 0.0  ;;  %v207_v29 = vsel %vm122_vm0, %v118_v25, 0.0  ;;  %v195_v30 = vsel %vm122_vm0, %v114_v26, 0.0  ;;  %1545 = vst [vmem:[#allocation20_spill] sm:$0xff] %v1092_v0  ;;  %v1100_v12 = vld [vmem:[#allocation2 + $0xf0] sm:$0xff] }
  0x20   :  { %v95_v31 = vmul.f32 %v994_v6, %v1030_v27  ;;  %v91_v32 = vmul.f32 %v994_v6, %v1032_v28  ;;  %v103_v37 = vmul.f32 %v994_v6, %v1040_v33  ;;  %v99_v38 = vmul.f32 %v994_v6, %v1042_v34  ;;  %1546 = vst [vmem:[#allocation21_spill] sm:$0xff] %v1100_v12  ;;  %v1102_v15 = vld [vmem:[#allocation2 + $0xd0] sm:$0xff]  ;;  %v1110_v20 = vld [vmem:[#allocation2 + $0x38] sm:$0xff] }
  0x21   :  { %v111_v43 = vmul.f32 %v994_v6, %v1050_v39  ;;  %v107_v44 = vmul.f32 %v994_v6, %v1052_v40  ;;  %v119_v49 = vmul.f32 %v994_v6, %v1060_v45  ;;  %v115_v50 = vmul.f32 %v994_v6, %v1062_v46  ;;  %1547 = vst [vmem:[#allocation22_spill] sm:$0xff] %v1102_v15  ;;  %v77_v40 = vld [vmem:[%s1502_s3 + $0x1] sm:$0x1] }
  0x22   :  { %v138_v35 = vsel %vm122_vm0, %v95_v31, 0.0  ;;  %v126_v36 = vsel %vm122_vm0, %v91_v32, 0.0  ;;  %v162_v41 = vsel %vm122_vm0, %v103_v37, 0.0  ;;  %v150_v42 = vsel %vm122_vm0, %v99_v38, 0.0  ;;  %v1122_v31 = vld [vmem:[#allocation2 + $0x58] sm:$0xff] }
  0x23   :  { %160 = vadd.xlane.f32.xlu1 %v159_v17  ;;  %136 = vadd.xlane.f32.xlu0 %v135_v18  ;;  %v186_v47 = vsel %vm122_vm0, %v111_v43, 0.0  ;;  %v174_v48 = vsel %vm122_vm0, %v107_v44, 0.0  ;;  %v210_v53 = vsel %vm122_vm0, %v119_v49, 0.0  ;;  %v198_v54 = vsel %vm122_vm0, %v115_v50, 0.0  ;;  %v1130_v38 = vld [vmem:[#allocation2 + $0xb8] sm:$0xff] }
  0x24   :  { %v96_v55 = vmul.f32 %v994_v6, %v1070_v51  ;;  %v92_v56 = vmul.f32 %v994_v6, %v1072_v52  ;;  %v104_v61 = vmul.f32 %v994_v6, %v1080_v57  ;;  %v100_v62 = vmul.f32 %v994_v6, %v1082_v58  ;;  %1548 = vst [vmem:[#allocation23_spill] sm:$0xff] %v1130_v38  ;;  %v1142_v49 = vld [vmem:[#allocation2 + $0xd8] sm:$0xff] }
  0x25   :  { %v112_v10 = vmul.f32 %v994_v6, %v1090_v63  ;;  %v108_v11 = vmul.f32 %v994_v6, %v1092_v0  ;;  %v120_v18 = vmul.f32 %v994_v6, %v1100_v12  ;;  %v116_v19 = vmul.f32 %v994_v6, %v1102_v15  ;;  %1551 = vst [vmem:[#allocation26_spill] sm:$0xff] %v1142_v49 }
  0x26   :  { %v141_v59 = vsel %vm122_vm0, %v96_v55, 0.0  ;;  %v129_v60 = vsel %vm122_vm0, %v92_v56, 0.0  ;;  %v165_v1 = vsel %vm122_vm0, %v104_v61, 0.0  ;;  %v153_v9 = vsel %vm122_vm0, %v100_v62, 0.0 }
  0x27   :  { %184 = vadd.xlane.f32.xlu1 %v183_v23  ;;  %172 = vadd.xlane.f32.xlu0 %v171_v24  ;;  %v189_v16 = vsel %vm122_vm0, %v112_v10, 0.0  ;;  %v177_v17 = vsel %vm122_vm0, %v108_v11, 0.0  ;;  %v1112_v23 = vld [vmem:[#allocation2 + $0x18] sm:$0xff]  ;;  %v213_v24 = vsel %vm122_vm0, %v120_v18, 0.0  ;;  %v201_v25 = vsel %vm122_vm0, %v116_v19, 0.0 }
  0x28   :  { %v97_v26 = vmul.f32 %v994_v6, %v1110_v20  ;;  %v101_v37 = vmul.f32 %v994_v6, %v1122_v31  ;;  %v113_v44 = vmul.f32 %v994_v6, %v1130_v38  ;;  %v117_v55 = vmul.f32 %v994_v6, %v1142_v49 }
  0x2a   :  { %v144_v32 = vsel %vm122_vm0, %v97_v26, 0.0  ;;  %v156_v43 = vsel %vm122_vm0, %v101_v37, 0.0  ;;  %v192_v50 = vsel %vm122_vm0, %v113_v44, 0.0 }
  0x2b   :  { %208 = vadd.xlane.f32.xlu1 %v207_v29  ;;  %196 = vadd.xlane.f32.xlu0 %v195_v30  ;;  %v93_v29 = vmul.f32 %v994_v6, %v1112_v23  ;;  %v1120_v30 = vld [vmem:[#allocation2 + $0x78] sm:$0xff] }
  0x2f   :  { %139 = vadd.xlane.f32.xlu1 %v138_v35  ;;  %127 = vadd.xlane.f32.xlu0 %v126_v36  ;;  %v132_v35 = vsel %vm122_vm0, %v93_v29, 0.0  ;;  %v105_v36 = vmul.f32 %v994_v6, %v1120_v30 }
  0x33   :  { %163 = vadd.xlane.f32.xlu1 %v162_v41  ;;  %151 = vadd.xlane.f32.xlu0 %v150_v42  ;;  %v1132_v41 = vld [vmem:[#allocation2 + $0x98] sm:$0xff]  ;;  %v168_v42 = vsel %vm122_vm0, %v105_v36, 0.0 }
  0x34   :  { %1549 = vst [vmem:[#allocation24_spill] sm:$0xff] %v1132_v41 }
  0x37   :  { %187 = vadd.xlane.f32.xlu1 %v186_v47  ;;  %175 = vadd.xlane.f32.xlu0 %v174_v48  ;;  %v109_v47 = vmul.f32 %v994_v6, %v1132_v41  ;;  %v1140_v48 = vld [vmem:[#allocation2 + $0xf8] sm:$0xff] }
  0x38   :  { %1550 = vst [vmem:[#allocation25_spill] sm:$0xff] %v1140_v48 }
  0x3b   :  { %211 = vadd.xlane.f32.xlu1 %v210_v53  ;;  %199 = vadd.xlane.f32.xlu0 %v198_v54  ;;  %v180_v53 = vsel %vm122_vm0, %v109_v47, 0.0  ;;  %v121_v54 = vmul.f32 %v994_v6, %v1140_v48 }
  0x3d   :  { %v216_v56 = vsel %vm122_vm0, %v121_v54, 0.0 }
  0x3f   :  { %142 = vadd.xlane.f32.xlu1 %v141_v59  ;;  %130 = vadd.xlane.f32.xlu0 %v129_v60  ;;  %v204_v59 = vsel %vm122_vm0, %v117_v55, 0.0 }
  0x43   :  { %166 = vadd.xlane.f32.xlu1 %v165_v1  ;;  %154 = vadd.xlane.f32.xlu0 %v153_v9 }
  0x47   :  { %190 = vadd.xlane.f32.xlu1 %v189_v16  ;;  %178 = vadd.xlane.f32.xlu0 %v177_v17 }
  0x4b   :  { %214 = vadd.xlane.f32.xlu1 %v213_v24  ;;  %202 = vadd.xlane.f32.xlu0 %v201_v25 }
  0x4f   :  { %145 = vadd.xlane.f32.xlu1 %v144_v32  ;;  %133 = vadd.xlane.f32.xlu0 %v132_v35 }
  0x53   :  { %169 = vadd.xlane.f32.xlu1 %v168_v42  ;;  %157 = vadd.xlane.f32.xlu0 %v156_v43 }
  0x57   :  { %193 = vadd.xlane.f32.xlu1 %v192_v50  ;;  %181 = vadd.xlane.f32.xlu0 %v180_v53 }
  0x5b   :  { %217 = vadd.xlane.f32.xlu1 %v216_v56  ;;  %205 = vadd.xlane.f32.xlu0 %v204_v59 }
  0xac   :  { %v1152_v60 = vpop.xlane.xlu1 %148  ;;  %v1154_v61 = vpop.xlane.xlu0 %124 }
  0xad   :  { %219 = vxpose.xlu0.b32.start [1/4] (short) (narrow) %v1154_v61, 8 }
  0xb0   :  { %v1157_v62 = vpop.xlane.xlu1 %160  ;;  %v1159_v1 = vpop.xlane.xlu0 %136 }
  0xb1   :  { %251 = vxpose.xlu1.b32.start [1/4] (short) (narrow) %v1159_v1, 8 }
  0xb4   :  { %v1162_v6 = vpop.xlane.xlu1 %184  ;;  %v1164_v9 = vpop.xlane.xlu0 %172 }
  0xb8   :  { %v1166_v10 = vpop.xlane.xlu1 %208  ;;  %v1168_v11 = vpop.xlane.xlu0 %196 }
  0xb9   :  { %1552 = vst [vmem:[#allocation27_spill] sm:$0xff] %v1166_v10  ;;  %1553 = vst [vmem:[#allocation28_spill] sm:$0xff] %v1168_v11 }
  0xbc   :  { %v1170_v16 = vpop.xlane.xlu1 %139  ;;  %v1172_v17 = vpop.xlane.xlu0 %127 }
  0xbd   :  { %220 = vxpose.xlu0.b32.cont [2/4] (short) (narrow) %v1172_v17, 8  ;;  %252 = vxpose.xlu1.b32.cont [2/4] (short) (narrow) %v1170_v16, 8 }
  0xc0   :  { %v1176_v18 = vpop.xlane.xlu1 %163  ;;  %v1178_v19 = vpop.xlane.xlu0 %151 }
  0xc4   :  { %v1180_v24 = vpop.xlane.xlu1 %187  ;;  %v1182_v25 = vpop.xlane.xlu0 %175 }
  0xc8   :  { %v1184_v26 = vpop.xlane.xlu1 %211  ;;  %v1186_v29 = vpop.xlane.xlu0 %199 }
  0xc9   :  { %1554 = vst [vmem:[#allocation29_spill] sm:$0xff] %v1184_v26  ;;  %1555 = vst [vmem:[#allocation30_spill] sm:$0xff] %v1186_v29 }
  0xcc   :  { %v1188_v32 = vpop.xlane.xlu1 %142  ;;  %v1190_v35 = vpop.xlane.xlu0 %130 }
  0xcd   :  { %221 = vxpose.xlu0.b32.cont [3/4] (short) (narrow) %v1190_v35, 8  ;;  %253 = vxpose.xlu1.b32.cont [3/4] (short) (narrow) %v1188_v32, 8 }
  0xd0   :  { %v1194_v36 = vpop.xlane.xlu1 %166  ;;  %v1196_v37 = vpop.xlane.xlu0 %154 }
  0xd4   :  { %v1198_v42 = vpop.xlane.xlu1 %190  ;;  %v1200_v43 = vpop.xlane.xlu0 %178 }
  0xd8   :  { %v1202_v44 = vpop.xlane.xlu1 %214  ;;  %v1204_v47 = vpop.xlane.xlu0 %202 }
  0xd9   :  { %1556 = vst [vmem:[#allocation31_spill] sm:$0xff] %v1202_v44  ;;  %1557 = vst [vmem:[#allocation32_spill] sm:$0xff] %v1204_v47 }
  0xdc   :  { %v1206_v50 = vpop.xlane.xlu1 %145  ;;  %v1208_v53 = vpop.xlane.xlu0 %133 }
  0xdd   :  { %254 = vxpose.xlu1.b32.end [4/4] (short) (narrow) %v1206_v50, 8  ;;  %222 = vxpose.xlu0.b32.end [4/4] (short) (narrow) %v1208_v53, 8 }
  0xe0   :  { %v1218_v54 = vpop.xlane.xlu1 %169  ;;  %v1220_v55 = vpop.xlane.xlu0 %157 }
  0xe1   :  { %315 = vxpose.xlu1.b32.start [1/4] (short) (narrow) %v1157_v62, 8  ;;  %283 = vxpose.xlu0.b32.start [1/4] (short) (narrow) %v1152_v60, 8 }
  0xe4   :  { %v1230_v56 = vpop.xlane.xlu1 %193  ;;  %v1232_v59 = vpop.xlane.xlu0 %181 }
  0xe5   :  { %316 = vxpose.xlu1.b32.cont [2/4] (short) (narrow) %v1176_v18, 8  ;;  %284 = vxpose.xlu0.b32.cont [2/4] (short) (narrow) %v1178_v19, 8  ;;  %1558 = vst [vmem:[#allocation33_spill] sm:$0xff] %v1232_v59 }
  0xe8   :  { %v1242_v49 = vpop.xlane.xlu1 %217  ;;  %v1244_v15 = vpop.xlane.xlu0 %205 }
  0xe9   :  { %317 = vxpose.xlu1.b32.cont [3/4] (short) (narrow) %v1194_v36, 8  ;;  %285 = vxpose.xlu0.b32.cont [3/4] (short) (narrow) %v1196_v37, 8  ;;  %1559 = vst [vmem:[#allocation34_spill] sm:$0xff] %v1242_v49  ;;  %1560 = vst [vmem:[#allocation35_spill] sm:$0xff] %v1244_v15 }
  0xed   :  { %318 = vxpose.xlu1.b32.end [4/4] (short) (narrow) %v1218_v54, 8  ;;  %286 = vxpose.xlu0.b32.end [4/4] (short) (narrow) %v1220_v55, 8 }
  0xf1   :  { %379 = vxpose.xlu1.b32.start [1/4] (short) (narrow) %v1162_v6, 8  ;;  %347 = vxpose.xlu0.b32.start [1/4] (short) (narrow) %v1164_v9, 8 }
  0xf5   :  { %380 = vxpose.xlu1.b32.cont [2/4] (short) (narrow) %v1180_v24, 8  ;;  %348 = vxpose.xlu0.b32.cont [2/4] (short) (narrow) %v1182_v25, 8 }
  0xf9   :  { %381 = vxpose.xlu1.b32.cont [3/4] (short) (narrow) %v1198_v42, 8  ;;  %349 = vxpose.xlu0.b32.cont [3/4] (short) (narrow) %v1200_v43, 8 }
  0xfd   :  { %382 = vxpose.xlu1.b32.end [4/4] (short) (narrow) %v1230_v56, 8  ;;  %350 = vxpose.xlu0.b32.end [4/4] (short) (narrow) %v1232_v59, 8 }
 0x101   :  { %443 = vxpose.xlu1.b32.start [1/4] (short) (narrow) %v1166_v10, 8  ;;  %411 = vxpose.xlu0.b32.start [1/4] (short) (narrow) %v1168_v11, 8 }
 0x105   :  { %444 = vxpose.xlu1.b32.cont [2/4] (short) (narrow) %v1184_v26, 8  ;;  %412 = vxpose.xlu0.b32.cont [2/4] (short) (narrow) %v1186_v29, 8  ;;  %v931_v26 = vmov 0  }
 0x109   :  { %445 = vxpose.xlu1.b32.cont [3/4] (short) (narrow) %v1202_v44, 8  ;;  %413 = vxpose.xlu0.b32.cont [3/4] (short) (narrow) %v1204_v47, 8 }
 0x10d   :  { %446 = vxpose.xlu1.b32.end [4/4] (short) (narrow) %v1242_v49, 8  ;;  %414 = vxpose.xlu0.b32.end [4/4] (short) (narrow) %v1244_v15, 8 }
 0x12b   :  { %839 = vset.pattern.permute.xlu1 %v931_v26 }
 0x136   :  { %838 = vset.pattern.permute.xlu0 %v931_v26 }
 0x151   :  { %v1248_v46 = vpop.trf.xlu1  ;;  %v1250_v22 = vpop.trf.xlu0 }
 0x152   :  { %1561 = vst [vmem:[#allocation36_spill] sm:$0xff] %v1248_v46  ;;  %1562 = vst [vmem:[#allocation37_spill] sm:$0xff] %v1250_v22  ;;  %v476_v48 = vmul.f32 %v1248_v46, %v986_v3  ;;  %v475_v12 = vmul.f32 %v1250_v22, %v986_v3 }
 0x154   :  { %v487_v45 = vsel %vm483_vm1, %v476_v48, 0.0  ;;  %v484_v21 = vsel %vm483_vm1, %v475_v12, 0.0 }
 0x155   :  { %488 = vadd.xlane.f32.xlu1 %v487_v45  ;;  %485 = vadd.xlane.f32.xlu0 %v484_v21 }
 0x161   :  { %v1258_v47 = vpop.trf.xlu1  ;;  %v1260_v15 = vpop.trf.xlu0 }
 0x162   :  { %v478_v29 = vmul.f32 %v1258_v47, %v986_v3  ;;  %v477_v11 = vmul.f32 %v1260_v15, %v986_v3 }
 0x164   :  { %v493_v49 = vsel %vm483_vm1, %v478_v29, 0.0  ;;  %v490_v44 = vsel %vm483_vm1, %v477_v11, 0.0 }
 0x165   :  { %494 = vadd.xlane.f32.xlu1 %v493_v49  ;;  %491 = vadd.xlane.f32.xlu0 %v490_v44 }
 0x171   :  { %v1268_v48 = vpop.trf.xlu1  ;;  %v1270_v45 = vpop.trf.xlu0 }
 0x172   :  { %v480_v21 = vmul.f32 %v1268_v48, %v986_v3  ;;  %v479_v12 = vmul.f32 %v1270_v45, %v986_v3 }
 0x174   :  { %v499_v10 = vsel %vm483_vm1, %v480_v21, 0.0  ;;  %v496_v29 = vsel %vm483_vm1, %v479_v12, 0.0 }
 0x175   :  { %500 = vadd.xlane.f32.xlu1 %v499_v10  ;;  %497 = vadd.xlane.f32.xlu0 %v496_v29 }
 0x181   :  { %v1278_v49 = vpop.trf.xlu1  ;;  %v1280_v11 = vpop.trf.xlu0 }
 0x182   :  { %1563 = vst [vmem:[#allocation38_spill] sm:$0xff] %v1278_v49  ;;  %1564 = vst [vmem:[#allocation39_spill] sm:$0xff] %v1280_v11  ;;  %v482_v44 = vmul.f32 %v1278_v49, %v986_v3  ;;  %v481_v41 = vmul.f32 %v1280_v11, %v986_v3  ;;  %v76_v3 = vld [vmem:[%s1502_s3] sm:$0x1] }
 0x184   :  { %v505_v0 = vsel %vm483_vm1, %v482_v44, 0.0  ;;  %v502_v26 = vsel %vm483_vm1, %v481_v41, 0.0 }
 0x185   :  { %506 = vadd.xlane.f32.xlu1 %v505_v0  ;;  %503 = vadd.xlane.f32.xlu0 %v502_v26  ;;  %v603_v26 = vrot.slane %v1248_v46, %v981_v2 }
 0x1e2   :  { %v489_v21 = vpop.xlane.xlu1 %488  ;;  %v486_v12 = vpop.xlane.xlu0 %485 }
 0x1e3   :  { %v509_v10 = vadd.f32 1.0, %v489_v21  ;;  %v508_v29 = vadd.f32 1.0, %v486_v12  ;;  %v599_v21 = vrot.slane %v1250_v22, %v981_v2 }
 0x1e5   :  { %840 = vrcp.f32 %v509_v10 }
 0x1e6   :  { %842 = vrcp.f32 %v508_v29 }
 0x1ef   :  { %v841_v11 = vpop.eup %840 }
 0x1f0   :  { %v843_v44 = vpop.eup %842  ;;  %v539_v41 = vrot.slane %v841_v11, %v981_v2  ;;  %v725_v0 = vmul.f32 %v841_v11, %v77_v40 }
 0x1f1   :  { %v535_v12 = vrot.slane %v843_v44, %v981_v2  ;;  %v724_v10 = vmul.f32 %v843_v44, %v76_v3 }
 0x1f2   :  { %v568_v29 = vmul.f32 %v539_v41, %v1159_v1  ;;  %v569_v49 = vmul.f32 %v539_v41, %v1170_v16  ;;  %v570_v14 = vmul.f32 %v539_v41, %v1188_v32  ;;  %v571_v38 = vmul.f32 %v539_v41, %v1206_v50  ;;  %739 = vperm.xlu1 %839, %v725_v0   ;;  %v495_v59 = vpop.xlane.xlu1 %494  ;;  %v492_v50 = vpop.xlane.xlu0 %491 }
 0x1f3   :  { %v564_v40 = vmul.f32 %v535_v12, %v1154_v61  ;;  %v565_v11 = vmul.f32 %v535_v12, %v1172_v17  ;;  %v566_v46 = vmul.f32 %v535_v12, %v1190_v35  ;;  %v567_v22 = vmul.f32 %v535_v12, %v1208_v53  ;;  %734 = vperm.xlu0 %838, %v724_v10  }
 0x1f4   :  { %v632_v63 = vmul.f32 %v603_v26, %v568_v29  ;;  %v633_v3 = vmul.f32 %v603_v26, %v569_v49  ;;  %v634_v44 = vmul.f32 %v603_v26, %v570_v14  ;;  %v635_v1 = vmul.f32 %v603_v26, %v571_v38 }
 0x1f5   :  { %v628_v39 = vmul.f32 %v599_v21, %v564_v40  ;;  %v629_v16 = vmul.f32 %v599_v21, %v565_v11  ;;  %v630_v13 = vmul.f32 %v599_v21, %v566_v46  ;;  %v631_v32 = vmul.f32 %v599_v21, %v567_v22  ;;  %v79_v46 = vld [vmem:[%s1502_s3 + $0x3] sm:$0x1] }
 0x1f6   :  { %v664_v41 = vsub.f32 %v998_v8, %v632_v63  ;;  %v665_v61 = vsub.f32 %v1030_v27, %v633_v3  ;;  %v666_v17 = vsub.f32 %v1070_v51, %v634_v44  ;;  %v667_v35 = vsub.f32 %v1110_v20, %v635_v1 }
 0x1f7   :  { %v660_v53 = vsub.f32 %v990_v5, %v628_v39  ;;  %v661_v49 = vsub.f32 %v1032_v28, %v629_v16  ;;  %v662_v14 = vsub.f32 %v1072_v52, %v630_v13  ;;  %v663_v38 = vsub.f32 %v1112_v23, %v631_v32  ;;  %v78_v28 = vld [vmem:[%s1502_s3 + $0x2] sm:$0x1] }
 0x1f8   :  { %696 = vst.msk [vmem:[#allocation5 + $0x20] sm:$0xff] %vm122_vm0, %v664_v41  ;;  %697 = vst.msk [vmem:[#allocation5 + $0x28] sm:$0xff] %vm122_vm0, %v665_v61  ;;  %v511_v8 = vadd.f32 1.0, %v495_v59  ;;  %v510_v22 = vadd.f32 1.0, %v492_v50  ;;  %v611_v63 = vrot.slane %v1258_v47, %v981_v2  ;;  %v607_v20 = vrot.slane %v1260_v15, %v981_v2 }
 0x1f9   :  { %698 = vst.msk [vmem:[#allocation5 + $0x30] sm:$0xff] %vm122_vm0, %v666_v17  ;;  %699 = vst.msk [vmem:[#allocation5 + $0x38] sm:$0xff] %vm122_vm0, %v667_v35 }
 0x1fa   :  { %692 = vst.msk [vmem:[#allocation5] sm:$0xff] %vm122_vm0, %v660_v53  ;;  %693 = vst.msk [vmem:[#allocation5 + $0x8] sm:$0xff] %vm122_vm0, %v661_v49  ;;  %844 = vrcp.f32 %v511_v8 }
 0x1fb   :  { %694 = vst.msk [vmem:[#allocation5 + $0x10] sm:$0xff] %vm122_vm0, %v662_v14  ;;  %695 = vst.msk [vmem:[#allocation5 + $0x18] sm:$0xff] %vm122_vm0, %v663_v38  ;;  %846 = vrcp.f32 %v510_v22 }
 0x202   :  { %v501_v5 = vpop.xlane.xlu1 %500  ;;  %v498_v13 = vpop.xlane.xlu0 %497 }
 0x203   :  { %v513_v27 = vadd.f32 1.0, %v501_v5  ;;  %v512_v39 = vadd.f32 1.0, %v498_v13 }
 0x204   :  { %v845_v51 = vpop.eup %844 }
 0x205   :  { %v847_v52 = vpop.eup %846  ;;  %v547_v23 = vrot.slane %v845_v51, %v981_v2  ;;  %848 = vrcp.f32 %v513_v27  ;;  %v727_v26 = vmul.f32 %v845_v51, %v79_v46 }
 0x206   :  { %v543_v59 = vrot.slane %v847_v52, %v981_v2  ;;  %v726_v0 = vmul.f32 %v847_v52, %v78_v28  ;;  %850 = vrcp.f32 %v512_v39  ;;  %v1565_v28 = vld [vmem:[#allocation33_spill] sm:$0xff] }
 0x207   :  { %v576_v21 = vmul.f32 %v547_v23, %v1157_v62  ;;  %v577_v12 = vmul.f32 %v547_v23, %v1176_v18  ;;  %v578_v10 = vmul.f32 %v547_v23, %v1194_v36  ;;  %v579_v29 = vmul.f32 %v547_v23, %v1218_v54 }
 0x208   :  { %v572_v40 = vmul.f32 %v543_v59, %v1152_v60  ;;  %v573_v11 = vmul.f32 %v543_v59, %v1178_v19  ;;  %v574_v3 = vmul.f32 %v543_v59, %v1196_v37  ;;  %v575_v44 = vmul.f32 %v543_v59, %v1220_v55  ;;  %744 = vperm.xlu1 %839, %v726_v0  }
 0x209   :  { %v640_v1 = vmul.f32 %v611_v63, %v576_v21  ;;  %v641_v16 = vmul.f32 %v611_v63, %v577_v12  ;;  %v642_v32 = vmul.f32 %v611_v63, %v578_v10  ;;  %v643_v50 = vmul.f32 %v611_v63, %v579_v29  ;;  %v1570_v10 = vld [vmem:[#allocation12_spill] sm:$0xff] }
 0x20a   :  { %v636_v62 = vmul.f32 %v607_v20, %v572_v40  ;;  %v637_v41 = vmul.f32 %v607_v20, %v573_v11  ;;  %v638_v18 = vmul.f32 %v607_v20, %v574_v3  ;;  %v639_v61 = vmul.f32 %v607_v20, %v575_v44  ;;  %v1571_v40 = vld [vmem:[#allocation16_spill] sm:$0xff] }
 0x20b   :  { %v672_v36 = vsub.f32 %v996_v7, %v640_v1  ;;  %v673_v54 = vsub.f32 %v1040_v33, %v641_v16  ;;  %v674_v60 = vsub.f32 %v1080_v57, %v642_v32  ;;  %v675_v19 = vsub.f32 %v1120_v30, %v643_v50  ;;  %v81_v7 = vld [vmem:[%s1502_s3 + $0x5] sm:$0x1]  ;;  %v1572_v3 = vld [vmem:[#allocation20_spill] sm:$0xff] }
 0x20c   :  { %v668_v37 = vsub.f32 %v988_v4, %v636_v62  ;;  %v669_v55 = vsub.f32 %v1042_v34, %v637_v41  ;;  %v670_v17 = vsub.f32 %v1082_v58, %v638_v18  ;;  %v671_v35 = vsub.f32 %v1122_v31, %v639_v61  ;;  %749 = vperm.xlu1 %839, %v727_v26   ;;  %v80_v4 = vld [vmem:[%s1502_s3 + $0x4] sm:$0x1]  ;;  %v1573_v1 = vld [vmem:[#allocation24_spill] sm:$0xff]  ;;  %v82_v62 = vld [vmem:[%s1502_s3 + $0x6] sm:$0x1] }
 0x20d   :  { %704 = vst.msk [vmem:[#allocation5 + $0x60] sm:$0xff] %vm122_vm0, %v672_v36  ;;  %705 = vst.msk [vmem:[#allocation5 + $0x68] sm:$0xff] %vm122_vm0, %v673_v54  ;;  %v619_v57 = vrot.slane %v1268_v48, %v981_v2  ;;  %v615_v30 = vrot.slane %v1270_v45, %v981_v2  ;;  %v83_v41 = vld [vmem:[%s1502_s3 + $0x7] sm:$0x1]  ;;  %s932_s3 = smov [#allocation5]  }
 0x20e   :  { %706 = vst.msk [vmem:[#allocation5 + $0x70] sm:$0xff] %vm122_vm0, %v674_v60  ;;  %707 = vst.msk [vmem:[#allocation5 + $0x78] sm:$0xff] %vm122_vm0, %v675_v19  ;;  %v1574_v36 = vld [vmem:[#allocation38_spill] sm:$0xff]  ;;  %v1575_v19 = vld [vmem:[#allocation39_spill] sm:$0xff]  ;;  %s801_s23 = sshll.u32 %s932_s3, 4  ;;  %s802_s23 = int_to_ptr.vmem [resolvable:$true] %s801_s23 }
 0x20f   :  { %700 = vst.msk [vmem:[#allocation5 + $0x40] sm:$0xff] %vm122_vm0, %v668_v37  ;;  %701 = vst.msk [vmem:[#allocation5 + $0x48] sm:$0xff] %vm122_vm0, %v669_v55  ;;  %v849_v33 = vpop.eup %848  ;;  %v627_v54 = vrot.slane %v1574_v36, %v981_v2  ;;  %v623_v37 = vrot.slane %v1575_v19, %v981_v2  ;;  %s878_s24 = scalar_lea.vmem %s802_s23, 4096  ;;  %p883_p9 = scmp.lt.s32.totalorder %s802_s23, %s802_s23 }
 0x210   :  { %702 = vst.msk [vmem:[#allocation5 + $0x50] sm:$0xff] %vm122_vm0, %v670_v17  ;;  %703 = vst.msk [vmem:[#allocation5 + $0x58] sm:$0xff] %vm122_vm0, %v671_v35  ;;  %v851_v34 = vpop.eup %850  ;;  %v555_v58 = vrot.slane %v849_v33, %v981_v2  ;;  %v729_v49 = vmul.f32 %v849_v33, %v81_v7  ;;  %v1577_v33 = vld [vmem:[#allocation29_spill] sm:$0xff]  ;;  %p879_p8 = scmp.ne.s32.totalorder %s802_s23, %s878_s24  ;;  %p884_p10 = scmp.lt.s32.totalorder %s878_s24, %s878_s24 }
 0x211   :  { %v551_v31 = vrot.slane %v851_v34, %v981_v2  ;;  %v728_v53 = vmul.f32 %v851_v34, %v80_v4  ;;  %v1576_v4 = vld [vmem:[#allocation27_spill] sm:$0xff] }
 0x212   :  { %v584_v14 = vmul.f32 %v555_v58, %v1162_v6  ;;  %v585_v38 = vmul.f32 %v555_v58, %v1180_v24  ;;  %v586_v8 = vmul.f32 %v555_v58, %v1198_v42  ;;  %v587_v22 = vmul.f32 %v555_v58, %v1230_v56  ;;  %v507_v42 = vpop.xlane.xlu1 %506  ;;  %v504_v59 = vpop.xlane.xlu0 %503  ;;  %v1566_v56 = vld [vmem:[#allocation11_spill] sm:$0xff]  ;;  %p885_p11 = por %p884_p10, %p883_p9 }
 0x213   :  { %v580_v5 = vmul.f32 %v551_v31, %v1164_v9  ;;  %v581_v13 = vmul.f32 %v551_v31, %v1182_v25  ;;  %v582_v27 = vmul.f32 %v551_v31, %v1200_v43  ;;  %v583_v39 = vmul.f32 %v551_v31, %v1565_v28  ;;  %754 = vperm.xlu1 %839, %v728_v53   ;;  %v1567_v9 = vld [vmem:[#allocation15_spill] sm:$0xff]  ;;  %v1580_v53 = vld [vmem:[#allocation28_spill] sm:$0xff] }
 0x214   :  { %v648_v46 = vmul.f32 %v619_v57, %v584_v14  ;;  %v649_v51 = vmul.f32 %v619_v57, %v585_v38  ;;  %v650_v52 = vmul.f32 %v619_v57, %v586_v8  ;;  %v651_v63 = vmul.f32 %v619_v57, %v587_v22  ;;  %v1568_v25 = vld [vmem:[#allocation19_spill] sm:$0xff]  ;;  %v1581_v14 = vld [vmem:[#allocation30_spill] sm:$0xff]  ;;  %v1582_v8 = vld [vmem:[#allocation32_spill] sm:$0xff]  ;;  %p886_p12 = pnand %p885_p11, %p879_p8 }
 0x215   :  { %v644_v6 = vmul.f32 %v615_v30, %v580_v5  ;;  %v645_v20 = vmul.f32 %v615_v30, %v581_v13  ;;  %v646_v24 = vmul.f32 %v615_v30, %v582_v27  ;;  %v647_v23 = vmul.f32 %v615_v30, %v583_v39  ;;  %v1569_v43 = vld [vmem:[#allocation23_spill] sm:$0xff]  ;;  %v1579_v30 = vld [vmem:[#allocation34_spill] sm:$0xff] }
 0x216   :  { %v680_v0 = vsub.f32 %v1566_v56, %v648_v46  ;;  %v681_v26 = vsub.f32 %v1567_v9, %v649_v51  ;;  %v682_v21 = vsub.f32 %v1568_v25, %v650_v52  ;;  %v683_v12 = vsub.f32 %v1569_v43, %v651_v63  ;;  %v1578_v57 = vld [vmem:[#allocation31_spill] sm:$0xff]  ;;  %v1587_v56 = vld [vmem:[#allocation25_spill] sm:$0xff]  ;;  %v1588_v9 = vld [vmem:[#allocation14_spill] sm:$0xff] }
 0x217   :  { %v676_v29 = vsub.f32 %v1570_v10, %v644_v6  ;;  %v677_v11 = vsub.f32 %v1571_v40, %v645_v20  ;;  %v678_v44 = vsub.f32 %v1572_v3, %v646_v24  ;;  %v679_v16 = vsub.f32 %v1573_v1, %v647_v23  ;;  %759 = vperm.xlu1 %839, %v729_v49   ;;  %v1583_v5 = vld [vmem:[#allocation35_spill] sm:$0xff]  ;;  %v1584_v6 = vld [vmem:[#allocation13_spill] sm:$0xff]  ;;  %v1589_v25 = vld [vmem:[#allocation18_spill] sm:$0xff] }
 0x218   :  { %712 = vst.msk [vmem:[#allocation5 + $0xa0] sm:$0xff] %vm122_vm0, %v680_v0  ;;  %713 = vst.msk [vmem:[#allocation5 + $0xa8] sm:$0xff] %vm122_vm0, %v681_v26  ;;  %v515_v32 = vadd.f32 1.0, %v507_v42  ;;  %v514_v50 = vadd.f32 1.0, %v504_v59  ;;  %v1585_v24 = vld [vmem:[#allocation17_spill] sm:$0xff]  ;;  %v1590_v43 = vld [vmem:[#allocation22_spill] sm:$0xff] }
 0x219   :  { %714 = vst.msk [vmem:[#allocation5 + $0xb0] sm:$0xff] %vm122_vm0, %v682_v21  ;;  %715 = vst.msk [vmem:[#allocation5 + $0xb8] sm:$0xff] %vm122_vm0, %v683_v12  ;;  %v1586_v42 = vld [vmem:[#allocation21_spill] sm:$0xff]  ;;  %v1591_v10 = vld [vmem:[#allocation26_spill] sm:$0xff] }
 0x21a   :  { %708 = vst.msk [vmem:[#allocation5 + $0x80] sm:$0xff] %vm122_vm0, %v676_v29  ;;  %709 = vst.msk [vmem:[#allocation5 + $0x88] sm:$0xff] %vm122_vm0, %v677_v11  ;;  %852 = vrcp.f32 %v515_v32 }
 0x21b   :  { %710 = vst.msk [vmem:[#allocation5 + $0x90] sm:$0xff] %vm122_vm0, %v678_v44  ;;  %711 = vst.msk [vmem:[#allocation5 + $0x98] sm:$0xff] %vm122_vm0, %v679_v16  ;;  %854 = vrcp.f32 %v514_v50 }
 0x224   :  { %v853_v18 = vpop.eup %852 }
 0x225   :  { %v855_v61 = vpop.eup %854  ;;  %v563_v60 = vrot.slane %v853_v18, %v981_v2  ;;  %v731_v35 = vmul.f32 %v853_v18, %v83_v41 }
 0x226   :  { %v559_v55 = vrot.slane %v855_v61, %v981_v2  ;;  %v730_v17 = vmul.f32 %v855_v61, %v82_v62 }
 0x227   :  { %v592_v7 = vmul.f32 %v563_v60, %v1576_v4  ;;  %v593_v34 = vmul.f32 %v563_v60, %v1577_v33  ;;  %v594_v58 = vmul.f32 %v563_v60, %v1578_v57  ;;  %v595_v31 = vmul.f32 %v563_v60, %v1579_v30 }
 0x228   :  { %v588_v49 = vmul.f32 %v559_v55, %v1580_v53  ;;  %v589_v38 = vmul.f32 %v559_v55, %v1581_v14  ;;  %v590_v22 = vmul.f32 %v559_v55, %v1582_v8  ;;  %v591_v13 = vmul.f32 %v559_v55, %v1583_v5  ;;  %764 = vperm.xlu1 %839, %v730_v17  }
 0x229   :  { %v656_v2 = vmul.f32 %v627_v54, %v592_v7  ;;  %v657_v27 = vmul.f32 %v627_v54, %v593_v34  ;;  %v658_v28 = vmul.f32 %v627_v54, %v594_v58  ;;  %v659_v39 = vmul.f32 %v627_v54, %v595_v31 }
 0x22a   :  { %v652_v46 = vmul.f32 %v623_v37, %v588_v49  ;;  %v653_v51 = vmul.f32 %v623_v37, %v589_v38  ;;  %v654_v52 = vmul.f32 %v623_v37, %v590_v22  ;;  %v655_v63 = vmul.f32 %v623_v37, %v591_v13 }
 0x22b   :  { %v688_v20 = vsub.f32 %v1584_v6, %v656_v2  ;;  %v689_v23 = vsub.f32 %v1585_v24, %v657_v27  ;;  %v690_v59 = vsub.f32 %v1586_v42, %v658_v28  ;;  %v691_v0 = vsub.f32 %v1587_v56, %v659_v39 }
 0x22c   :  { %v684_v26 = vsub.f32 %v1588_v9, %v652_v46  ;;  %v685_v21 = vsub.f32 %v1589_v25, %v653_v51  ;;  %v686_v12 = vsub.f32 %v1590_v43, %v654_v52  ;;  %v687_v29 = vsub.f32 %v1591_v10, %v655_v63  ;;  %769 = vperm.xlu1 %839, %v731_v35  }
 0x22d   :  { %720 = vst.msk [vmem:[#allocation5 + $0xe0] sm:$0xff] %vm122_vm0, %v688_v20  ;;  %721 = vst.msk [vmem:[#allocation5 + $0xe8] sm:$0xff] %vm122_vm0, %v689_v23 }
 0x22e   :  { %722 = vst.msk [vmem:[#allocation5 + $0xf0] sm:$0xff] %vm122_vm0, %v690_v59  ;;  %723 = vst.msk [vmem:[#allocation5 + $0xf8] sm:$0xff] %vm122_vm0, %v691_v0 }
 0x22f   :  { %716 = vst.msk [vmem:[#allocation5 + $0xc0] sm:$0xff] %vm122_vm0, %v684_v26  ;;  %717 = vst.msk [vmem:[#allocation5 + $0xc8] sm:$0xff] %vm122_vm0, %v685_v21 }
 0x230   :  { %718 = vst.msk [vmem:[#allocation5 + $0xd0] sm:$0xff] %vm122_vm0, %v686_v12  ;;  %719 = vst.msk [vmem:[#allocation5 + $0xd8] sm:$0xff] %vm122_vm0, %v687_v29 }
 0x231   :  { %889 = shalt.err (!%p886_p12)
}
 0x232   :  { %s890_s27 = scalar_lea.hbm %s1503_s4, 4096 }
 0x233   :  { %p891_p13 = scmp.ne.s32.totalorder %s1503_s4, %s890_s27  ;;  %p894_p0 = scmp.lt.u32.totalorder %s890_s27, %s1503_s4 }
 0x235   :  { %p896_p1 = pnand %p894_p0, %p891_p13 }
 0x237   :  { %899 = shalt.err (!%p896_p1)
}
 0x238   :  { %807 = dma.vmem_to_hbm [thread:$0]  %s802_s23, 4096, %s1503_s4, [#allocation4], %s929_s28, %s929_s28, %s930_s29   ;;  %v1592_v3 = vld [vmem:[#allocation36_spill] sm:$0xff]  ;;  %v1593_v32 = vld [vmem:[#allocation37_spill] sm:$0xff] }
 0x239   :  { %v69_v40 = vld [vmem:[%s1501_s2 + $0x1] sm:$0x1]  ;;  %v68_v1 = vld [vmem:[%s1501_s2] sm:$0x1]  ;;  %v70_v18 = vld [vmem:[%s1501_s2 + $0x2] sm:$0x1] }
 0x23a   :  { %v71_v37 = vld [vmem:[%s1501_s2 + $0x3] sm:$0x1]  ;;  %v72_v4 = vld [vmem:[%s1501_s2 + $0x4] sm:$0x1]  ;;  %v73_v34 = vld [vmem:[%s1501_s2 + $0x5] sm:$0x1] }
 0x23b   :  { %v74_v30 = vld [vmem:[%s1501_s2 + $0x6] sm:$0x1]  ;;  %s933_s20 = smov [#allocation6]   ;;  %v75_v49 = vld [vmem:[%s1501_s2 + $0x7] sm:$0x1] }
 0x23c   :  { %s813_s21 = sshll.u32 %s933_s20, 4  ;;  %s814_s21 = int_to_ptr.vmem [resolvable:$true] %s813_s21 }
 0x23d   :  { %s900_s23 = scalar_lea.vmem %s814_s21, 128  ;;  %p905_p3 = scmp.lt.s32.totalorder %s814_s21, %s814_s21 }
 0x23e   :  { %p901_p2 = scmp.ne.s32.totalorder %s814_s21, %s900_s23  ;;  %p906_p4 = scmp.lt.s32.totalorder %s900_s23, %s900_s23 }
 0x240   :  { %p907_p5 = por %p906_p4, %p905_p3 }
 0x242   :  { %p908_p6 = pnand %p907_p5, %p901_p2 }
 0x271   :  { %v740_v11 = vpop.permute.xlu1 %739 }
 0x272   :  { %v773_v44 = vmul.f32 %v740_v11, %v1592_v3  ;;  %v735_v16 = vpop.permute.xlu0 %734 }
 0x273   :  { %v772_v50 = vmul.f32 %v735_v16, %v1593_v32 }
 0x274   :  { %v781_v62 = vsub.f32 %v69_v40, %v773_v44 }
 0x275   :  { %v780_v41 = vsub.f32 %v68_v1, %v772_v50 }
 0x276   :  { %789 = vst.msk [vmem:[#allocation6 + $0x1] sm:$0x1] %vm483_vm1, %v781_v62 }
 0x277   :  { %788 = vst.msk [vmem:[#allocation6] sm:$0x1] %vm483_vm1, %v780_v41 }
 0x287   :  { %v745_v61 = vpop.permute.xlu1 %744 }
 0x288   :  { %v774_v54 = vmul.f32 %v745_v61, %v1260_v15 }
 0x28a   :  { %v782_v60 = vsub.f32 %v70_v18, %v774_v54 }
 0x28b   :  { %v750_v55 = vpop.permute.xlu1 %749 }
 0x28c   :  { %790 = vst.msk [vmem:[#allocation6 + $0x2] sm:$0x1] %vm483_vm1, %v782_v60  ;;  %v775_v17 = vmul.f32 %v750_v55, %v1258_v47 }
 0x28e   :  { %v783_v35 = vsub.f32 %v71_v37, %v775_v17 }
 0x290   :  { %791 = vst.msk [vmem:[#allocation6 + $0x3] sm:$0x1] %vm483_vm1, %v783_v35 }
 0x292   :  { %v755_v7 = vpop.permute.xlu1 %754 }
 0x293   :  { %v776_v15 = vmul.f32 %v755_v7, %v1270_v45 }
 0x295   :  { %v784_v33 = vsub.f32 %v72_v4, %v776_v15 }
 0x296   :  { %v760_v57 = vpop.permute.xlu1 %759 }
 0x297   :  { %792 = vst.msk [vmem:[#allocation6 + $0x4] sm:$0x1] %vm483_vm1, %v784_v33  ;;  %v777_v47 = vmul.f32 %v760_v57, %v1268_v48 }
 0x299   :  { %v785_v58 = vsub.f32 %v73_v34, %v777_v47 }
 0x29b   :  { %793 = vst.msk [vmem:[#allocation6 + $0x5] sm:$0x1] %vm483_vm1, %v785_v58 }
 0x2a7   :  { %v765_v31 = vpop.permute.xlu1 %764 }
 0x2a8   :  { %v778_v45 = vmul.f32 %v765_v31, %v1575_v19 }
 0x2aa   :  { %v786_v53 = vsub.f32 %v74_v30, %v778_v45 }
 0x2ab   :  { %v770_v14 = vpop.permute.xlu1 %769 }
 0x2ac   :  { %794 = vst.msk [vmem:[#allocation6 + $0x6] sm:$0x1] %vm483_vm1, %v786_v53  ;;  %v779_v48 = vmul.f32 %v770_v14, %v1574_v36 }
 0x2ae   :  { %v787_v38 = vsub.f32 %v75_v49, %v779_v48 }
 0x2b0   :  { %795 = vst.msk [vmem:[#allocation6 + $0x7] sm:$0x1] %vm483_vm1, %v787_v38 }
 0x2b1   :  { %911 = shalt.err (!%p908_p6)
}
 0x2b2   :  { %s912_s2 = scalar_lea.hbm %s1504_s5, 128 }
 0x2b3   :  { %p913_p7 = scmp.ne.s32.totalorder %s1504_s5, %s912_s2  ;;  %p916_p8 = scmp.lt.u32.totalorder %s912_s2, %s1504_s5 }
 0x2b5   :  { %p918_p9 = pnand %p916_p8, %p913_p7 }
 0x2b7   :  { %921 = shalt.err (!%p918_p9)
}
 0x2b8   :  { %s934_s7 = smov 16   ;;  %s935_s8 = smov 1  }
 0x2b9   :  { %819 = dma.vmem_to_hbm [thread:$0]  %s814_s21, 128, %s1504_s5, [#allocation7], %s934_s7, %s934_s7, %s935_s8  }
 0x2ba   :  { %924 = dma.done.wait [#allocation4], 4096  }
 0x2bb   :  { %925 = vsyncadd [#allocation4], 4294963200 }
 0x2bc   :  { %926 = dma.done.wait [#allocation7], 128  }
 0x2bd   :  { %927 = vsyncadd [#allocation7], 4294967168 }
 0x2be   :  { %826 = vsyncpa [#allocation3], 1 }
 0x2bf   :  { %827 = vsyncpa [#allocation4], 1 }
 0x2c0   :  { %828 = vsyncpa [#allocation7], 1 }

</bundles_post_ra>
